<compile_context>
chip_gen: v6e
topology: v6e:2x2x1
jax: 0.10.0
libtpu: 0.0.40
codegen_flags: <defaults>
</compile_context>

<pallas_src>
import functools

import jax
import jax.numpy as jnp
from jax.experimental import pallas as pl
from jax.experimental.pallas import tpu as pltpu


def _round_up(x, m):
    return ((x + m - 1) // m) * m


def _choose_node_tiles(n):
    """Pick (N_pad, tm, tk).

    The node axis is padded to the row tile tm (<=512) so tiling never
    degrades to 128-wide blocks for awkward N; tk (reduction over A columns /
    hidden rows) is 2*tm when that still divides N_pad (bigger DMA bursts).
    """
    tm = min(512, _round_up(n, 128))
    n_pad = _round_up(n, tm)
    tk = 2 * tm if (n_pad % (2 * tm) == 0 and 2 * tm <= 1024) else tm
    return n_pad, tm, tk


_VMEM_LIMIT_BYTES = 48 * 1024 * 1024          # safe on v5e/v6e (128 MiB) and v7x (64 MiB)
_HIDDEN_RESIDENT_BUDGET = 8 * 1024 * 1024     # 2x-buffered bf16 hidden must fit here


# ---------------------------------------------------------------------------
# Kernel 1: hidden = x @ W.T + b   (computed exactly once, output in bf16)
# ---------------------------------------------------------------------------
def _linear_kernel(x_ref, wt_ref, b_ref, h_ref):
    h = jnp.dot(x_ref[...], wt_ref[...], preferred_element_type=jnp.float32)
    h_ref[...] = (h + b_ref[...]).astype(h_ref.dtype)


def linear_pallas(x_pad, w_t_pad, b_pad, *, tn, compute_dtype):
    n_pad, f_in_pad = x_pad.shape
    f_out_pad = w_t_pad.shape[1]
    return pl.pallas_call(
        _linear_kernel,
        out_shape=jax.ShapeDtypeStruct((n_pad, f_out_pad), compute_dtype),
        grid_spec=pltpu.PrefetchScalarGridSpec(
            num_scalar_prefetch=0,
            grid=(n_pad // tn,),
            in_specs=[
                pl.BlockSpec((tn, f_in_pad), lambda i: (i, 0)),        # x (read once)
                pl.BlockSpec((f_in_pad, f_out_pad), lambda i: (0, 0)),  # W.T resident
                pl.BlockSpec((1, f_out_pad), lambda i: (0, 0)),         # bias resident
            ],
            out_specs=pl.BlockSpec((tn, f_out_pad), lambda i: (i, 0)),
        ),
        compiler_params=pltpu.CompilerParams(
            dimension_semantics=("parallel",),
        ),
    )(x_pad, w_t_pad, b_pad)


# ---------------------------------------------------------------------------
# Kernel 2: out[i, :] += A[i, k] @ hidden[k, :]
#   grid = (N//tm, N//tk); i parallel, k = reduction (arbitrary, last).
#   A is streamed exactly once; the f32 output block is the accumulator
#   (resident across k).  hidden is either fully VMEM-resident (constant
#   index_map, DMA'd once) or streamed in (tk, F_out) tiles.
# ---------------------------------------------------------------------------
def _aggregate_kernel_resident(a_ref, h_ref, o_ref, *, tk):
    k = pl.program_id(1)

    @pl.when(k == 0)
    def _():
        o_ref[...] = jnp.zeros_like(o_ref)

    row0 = pl.multiple_of(k * tk, tk)
    o_ref[...] += jnp.dot(a_ref[...], h_ref[pl.ds(row0, tk), :],
                          preferred_element_type=jnp.float32)


def _aggregate_kernel_streamed(a_ref, h_ref, o_ref):
    k = pl.program_id(1)

    @pl.when(k == 0)
    def _():
        o_ref[...] = jnp.zeros_like(o_ref)

    o_ref[...] += jnp.dot(a_ref[...], h_ref[...],
                          preferred_element_type=jnp.float32)


def aggregate_pallas(a_pad, hidden_pad, *, tm, tk):
    n_pad = a_pad.shape[0]
    f_out_pad = hidden_pad.shape[1]
    hidden_bytes = hidden_pad.size * hidden_pad.dtype.itemsize
    resident = 2 * hidden_bytes <= _HIDDEN_RESIDENT_BUDGET

    if resident:
        kernel = functools.partial(_aggregate_kernel_resident, tk=tk)
        h_spec = pl.BlockSpec((n_pad, f_out_pad), lambda i, k: (0, 0))
    else:
        kernel = _aggregate_kernel_streamed
        h_spec = pl.BlockSpec((tk, f_out_pad), lambda i, k: (k, 0))

    cost = pl.CostEstimate(
        flops=2 * n_pad * n_pad * f_out_pad,
        transcendentals=0,
        bytes_accessed=(a_pad.size * a_pad.dtype.itemsize
                        + hidden_bytes
                        + n_pad * f_out_pad * 4),
    )

    return pl.pallas_call(
        kernel,
        out_shape=jax.ShapeDtypeStruct((n_pad, f_out_pad), jnp.float32),
        grid_spec=pltpu.PrefetchScalarGridSpec(
            num_scalar_prefetch=0,
            grid=(n_pad // tm, n_pad // tk),
            in_specs=[
                pl.BlockSpec((tm, tk), lambda i, k: (i, k)),  # A: streamed exactly once
                h_spec,                                       # hidden
            ],
            out_specs=pl.BlockSpec((tm, f_out_pad), lambda i, k: (i, 0)),
        ),
        compiler_params=pltpu.CompilerParams(
            dimension_semantics=("parallel", "arbitrary"),
            vmem_limit_bytes=_VMEM_LIMIT_BYTES,
        ),
        cost_estimate=cost,
    )(a_pad, hidden_pad)


# ---------------------------------------------------------------------------
# Module wrapper (dense path of GCNConv_dense.forward; sparse=False)
# ---------------------------------------------------------------------------
class GCNConvDensePallas:
    """out = A @ (x @ W.T + b).

    compute_dtype (default bf16) is an explicit accuracy/perf knob: both
    matmuls use compute_dtype operands with f32 accumulation.  Pass
    jnp.float32 for exact PyTorch-f32 semantics (at ~2x the HBM traffic).
    """

    def __init__(self, input_size, output_size, key, *, compute_dtype=jnp.bfloat16):
        kw, kb = jax.random.split(key)
        bound = 1.0 / jnp.sqrt(jnp.float32(input_size))
        self.weight = jax.random.uniform(
            kw, (output_size, input_size), jnp.float32, -bound, bound)
        self.bias = jax.random.uniform(
            kb, (output_size,), jnp.float32, -bound, bound)
        self.input_size = input_size
        self.output_size = output_size
        self.compute_dtype = compute_dtype

        # Pad features to lane width (128) once: lane-dense, unmasked stores.
        # Padded rows/cols of W.T and bias are zero -> padded hidden columns
        # are exactly zero, so slicing the output back is exact.
        f_in_pad = _round_up(input_size, 128)
        f_out_pad = _round_up(output_size, 128)
        w_t = jnp.zeros((f_in_pad, f_out_pad), jnp.float32)
        w_t = w_t.at[:input_size, :output_size].set(self.weight.T)
        self._w_t_pad = w_t.astype(compute_dtype)
        self._b_pad = (jnp.zeros((1, f_out_pad), jnp.float32)
                       .at[0, :output_size].set(self.bias))
        self._f_in_pad = f_in_pad
        self._f_out_pad = f_out_pad

        # Adjacency is static across layers/epochs: pad + cast it exactly once
        # and cache (identity-keyed), so the forward pass never re-reads A
        # outside the kernel.
        self._adj_key = None
        self._adj_prepared = None

    def prepare_adjacency(self, A):
        """Pad A's node axis to the tile and cast to compute_dtype (done once).

        Correctness relies on the padded rows/columns of A being ZERO (padded
        hidden rows equal the bias but are multiplied by zero columns).  Do
        not feed a pre-padded A with garbage in the padded region.
        """
        n = A.shape[0]
        n_pad, tm, tk = _choose_node_tiles(n)
        a_pad = A.astype(self.compute_dtype)
        if n_pad != n:
            a_pad = jnp.pad(a_pad, ((0, n_pad - n), (0, n_pad - n)))
        return a_pad, n, n_pad, tm, tk

    def __call__(self, x, A):
        # TODO(synk): sparse=True path (torch.sparse.mm) not implemented; dense only.
        n, f_in = x.shape
        assert f_in == self.input_size
        assert A.shape == (n, n)

        if A is not self._adj_key:
            self._adj_key = A
            self._adj_prepared = self.prepare_adjacency(A)
        a_pad, n_cached, n_pad, tm, tk = self._adj_prepared
        assert n_cached == n

        # x is small (N x F_in): per-call pad/cast is cheap and read once.
        x_pad = x.astype(self.compute_dtype)
        pad_rows = n_pad - n
        pad_cols = self._f_in_pad - f_in
        if pad_rows or pad_cols:
            x_pad = jnp.pad(x_pad, ((0, pad_rows), (0, pad_cols)))

        hidden = linear_pallas(x_pad, self._w_t_pad, self._b_pad,
                               tn=tm, compute_dtype=self.compute_dtype)
        out = aggregate_pallas(a_pad, hidden, tm=tm, tk=tk)
        return out[:n, :self.output_size]


if __name__ == "__main__":
    key = jax.random.PRNGKey(0)
    k_x, k_a, k_p = jax.random.split(key, 3)

    # Small shapes that exercise node-, F_in- and F_out-padding paths.
    num_nodes = 200
    input_size = 96
    output_size = 80

    x = jax.random.normal(k_x, (num_nodes, input_size), jnp.float32)
    # Simple dense "adjacency": random nonnegative, row-normalized.
    A = jax.random.uniform(k_a, (num_nodes, num_nodes), jnp.float32)
    A = A / jnp.sum(A, axis=-1, keepdims=True)

    model = GCNConvDensePallas(input_size, output_size, k_p)
    out = jax.block_until_ready(model(x, A))
    assert out.shape == (num_nodes, output_size)

    # Second call reuses the cached padded/bf16 adjacency (no re-pad/re-cast).
    out2 = jax.block_until_ready(model(x, A))
    assert bool(jnp.allclose(out, out2))

    # Reference with matching bf16 operand quantization (f32 accumulation).
    hid = (jnp.dot(x.astype(jnp.bfloat16), model.weight.T.astype(jnp.bfloat16),
                   preferred_element_type=jnp.float32) + model.bias)
    ref_bf16 = jnp.dot(A.astype(jnp.bfloat16), hid.astype(jnp.bfloat16),
                       preferred_element_type=jnp.float32)
    assert bool(jnp.allclose(out, ref_bf16, atol=1e-2, rtol=1e-2))

    # Looser sanity check against the pure-f32 PyTorch semantics.
    ref_f32 = A @ (x @ model.weight.T + model.bias)
    assert bool(jnp.allclose(out, ref_f32, atol=5e-2, rtol=5e-2))

    print("KERNEL_OK")
</pallas_src>

<mosaic_0001>
module attributes {stable_mosaic.version = 11 : i64} {
  func.func @_linear_kernel(%arg0: i32, %arg1: memref<256x128xbf16, #tpu.memory_space<vmem>>, %arg2: memref<128x128xbf16, #tpu.memory_space<vmem>>, %arg3: memref<1x128xf32, #tpu.memory_space<vmem>>, %arg4: memref<256x128xbf16, #tpu.memory_space<vmem>>) attributes {dimension_semantics = [#tpu.dimension_semantics<parallel>], iteration_bounds = array<i64: 1>, scalar_prefetch = 0 : i64, scratch_operands = 0 : i64, tpu.core_type = #tpu.core_type<tc>, window_params = [{transform_indices = @transform_0, window_bounds = array<i64: 256, 128>}, {pipeline_mode = #tpu.pipeline_mode<synchronous>, transform_indices = @transform_1, window_bounds = array<i64: 128, 128>}, {pipeline_mode = #tpu.pipeline_mode<synchronous>, transform_indices = @transform_2, window_bounds = array<i64: 1, 128>}, {transform_indices = @transform_3, window_bounds = array<i64: 256, 128>}]} {
    %c0 = arith.constant 0 : index
    %c0_0 = arith.constant 0 : index
    %0 = vector.load %arg1[%c0, %c0_0] : memref<256x128xbf16, #tpu.memory_space<vmem>>, vector<256x128xbf16>
    %c0_1 = arith.constant 0 : index
    %c0_2 = arith.constant 0 : index
    %1 = vector.load %arg2[%c0_1, %c0_2] : memref<128x128xbf16, #tpu.memory_space<vmem>>, vector<128x128xbf16>
    %cst = arith.constant dense<0.000000e+00> : vector<256x128xf32>
    %2 = tpu.matmul %0, %1, %cst {dimension_numbers = #tpu.dot_dimension_numbers<[1], [0], [0], [1], [0, 0, 1, 1], [], []>} : vector<256x128xbf16>, vector<128x128xbf16>, vector<256x128xf32> -> vector<256x128xf32>
    %c0_3 = arith.constant 0 : index
    %c0_4 = arith.constant 0 : index
    %3 = vector.load %arg3[%c0_3, %c0_4] : memref<1x128xf32, #tpu.memory_space<vmem>>, vector<1x128xf32>
    %4 = vector.broadcast %3 : vector<1x128xf32> to vector<256x128xf32>
    %5 = arith.addf %2, %4 : vector<256x128xf32>
    %6 = arith.truncf %5 : vector<256x128xf32> to vector<256x128xbf16>
    %c0_5 = arith.constant 0 : index
    %c0_6 = arith.constant 0 : index
    %7 = vector.load %arg4[%c0_5, %c0_6] : memref<256x128xbf16, #tpu.memory_space<vmem>>, vector<256x128xbf16>
    tpu.vector_store %arg4[%c0_5, %c0_6], %6 {strides = array<i32>} : memref<256x128xbf16, #tpu.memory_space<vmem>>, vector<256x128xbf16>,
    return
  }
  func.func @transform_0(%arg0: i32) -> (i32, i32) {
    %c0_i32 = arith.constant 0 : i32
    %c0_i32_0 = arith.constant 0 : i32
    return %arg0, %c0_i32 : i32, i32
  }
  func.func @transform_1(%arg0: i32) -> (i32, i32) {
    %c0_i32 = arith.constant 0 : i32
    %c0_i32_0 = arith.constant 0 : i32
    %c0_i32_1 = arith.constant 0 : i32
    return %c0_i32, %c0_i32_0 : i32, i32
  }
  func.func @transform_2(%arg0: i32) -> (i32, i32) {
    %c0_i32 = arith.constant 0 : i32
    %c0_i32_0 = arith.constant 0 : i32
    %c0_i32_1 = arith.constant 0 : i32
    return %c0_i32, %c0_i32_0 : i32, i32
  }
  func.func @transform_3(%arg0: i32) -> (i32, i32) {
    %c0_i32 = arith.constant 0 : i32
    %c0_i32_0 = arith.constant 0 : i32
    return %arg0, %c0_i32 : i32, i32
  }
}

</mosaic_0001>

<bundles_post_ra>
// kernel: tpu_custom_call.1
= control target key start
LH: loop header
LB: loop body
LE: loop exit
PB: predicated region body
PF: predicated region fallthrough
CT: control target
= control target key end

     0   :  { %8 = vsyncpa [#allocation3], 0  ;;  %s1029_s0 = inlined_call_operand.hbm [shape: bf16[256,128], index: 0, kind: input, shape index: {}]   ;;  %s1030_s1 = inlined_call_operand.hbm [shape: bf16[128,128], index: 1, kind: input, shape index: {}]   ;;  %s1031_s2 = inlined_call_operand.vmem [shape: f32[1,128], index: 2, kind: input, shape index: {}]   ;;  %s1032_s3 = inlined_call_operand.hbm [shape: bf16[256,128], index: 3, kind: output, shape index: {}]  }
   0x1   :  { %9 = vsyncpa [#allocation6], 0 }
   0x2   :  { %10 = vsyncpa [#allocation4], 0  ;;  %s949_s12 = smov [#allocation2]  }
   0x3   :  { %s16_s13 = sshll.u32 %s949_s12, 4  ;;  %s17_s13 = int_to_ptr.vmem [resolvable:$true] %s16_s13 }
   0x4   :  { %s891_s14 = scalar_lea.vmem %s17_s13, 2048  ;;  %p896_p1 = scmp.lt.s32.totalorder %s17_s13, %s17_s13 }
   0x5   :  { %p892_p0 = scmp.ne.s32.totalorder %s17_s13, %s891_s14  ;;  %p897_p2 = scmp.lt.s32.totalorder %s891_s14, %s891_s14 }
   0x7   :  { %p898_p3 = por %p897_p2, %p896_p1 }
   0x9   :  { %p899_p4 = pnand %p898_p3, %p892_p0 }
   0xb   :  { %902 = shalt.err (!%p899_p4)
}
   0xc   :  { %s950_s15 = smov 64   ;;  %s951_s16 = smov 4  }
   0xd   :  { %22 = dma.hbm_to_vmem [thread:$0]  %s1029_s0, 2048, %s17_s13, [#allocation3], %s950_s15, %s950_s15, %s951_s16  }
   0xe   :  { %s952_s19 = smov [#allocation5]  }
   0xf   :  { %s28_s20 = sshll.u32 %s952_s19, 4  ;;  %s29_s20 = int_to_ptr.vmem [resolvable:$true] %s28_s20 }
  0x10   :  { %s911_s21 = scalar_lea.vmem %s29_s20, 1024  ;;  %p916_p6 = scmp.lt.s32.totalorder %s29_s20, %s29_s20 }
  0x11   :  { %p912_p5 = scmp.ne.s32.totalorder %s29_s20, %s911_s21  ;;  %p917_p7 = scmp.lt.s32.totalorder %s911_s21, %s911_s21 }
  0x13   :  { %p918_p8 = por %p917_p7, %p916_p6 }
  0x15   :  { %p919_p9 = pnand %p918_p8, %p912_p5 }
  0x17   :  { %922 = shalt.err (!%p919_p9)
}
  0x18   :  { %34 = dma.hbm_to_vmem [thread:$0]  %s1030_s1, 1024, %s29_s20, [#allocation6], %s950_s15, %s950_s15, %s951_s16  }
  0x19   :  { %943 = dma.done.wait [#allocation3], 2048  }
  0x1a   :  { %944 = vsyncadd [#allocation3], 4294965248 }
  0x1b   :  { %945 = dma.done.wait [#allocation6], 1024  }
  0x1c   :  { %946 = vsyncadd [#allocation6], 4294966272  ;;  %v859_v0 = vld [vmem:[#allocation5 + $0x38] sm:$0xff]   ;;  %v860_v1 = vld [vmem:[#allocation5 + $0x30] sm:$0xff]  }
  0x1d   :  { %790 = vmatprep.subr.bf16.mxu0 %v859_v0  ;;  %838 = vmatprep.subr.bf16.mxu1 %v859_v0  ;;  %v861_v2 = vld [vmem:[#allocation5 + $0x28] sm:$0xff]   ;;  %v862_v3 = vld [vmem:[#allocation5 + $0x20] sm:$0xff]   ;;  %v863_v6 = vld [vmem:[#allocation5 + $0x18] sm:$0xff]  }
  0x1e   :  { %791 = vmatpush3.bf16.msra.mxu0 %v859_v0  ;;  %846 = vmatpush3.bf16.msra.mxu1 %v859_v0  ;;  %v867_v4 = vld [vmem:[#allocation2] sm:$0xff]   ;;  %v864_v7 = vld [vmem:[#allocation5 + $0x10] sm:$0xff]   ;;  %v865_v8 = vld [vmem:[#allocation5 + $0x8] sm:$0xff]  }
  0x1f   :  { %792 = vmatprep.subr.bf16.mxu0 %v860_v1  ;;  %839 = vmatprep.subr.bf16.mxu1 %v860_v1  ;;  %v868_v5 = vld [vmem:[#allocation2 + $0x40] sm:$0xff]   ;;  %v869_v10 = vld [vmem:[#allocation2 + $0x8] sm:$0xff]   ;;  %v871_v12 = vld [vmem:[#allocation2 + $0x10] sm:$0xff]  }
  0x20   :  { %806 = vmatprep.mubr.bf16.mxu0 %v867_v4  ;;  %822 = vmatprep.mubr.bf16.mxu1 %v868_v5  ;;  %v866_v9 = vld [vmem:[#allocation5] sm:$0xff]   ;;  %v870_v11 = vld [vmem:[#allocation2 + $0x48] sm:$0xff]   ;;  %v872_v13 = vld [vmem:[#allocation2 + $0x50] sm:$0xff]  }
  0x21   :  { %v873_v14 = vld [vmem:[#allocation2 + $0x18] sm:$0xff]   ;;  %v875_v16 = vld [vmem:[#allocation2 + $0x20] sm:$0xff]   ;;  %v877_v18 = vld [vmem:[#allocation2 + $0x28] sm:$0xff]  }
  0x22   :  { %793 = vmatpush3.bf16.msra.mxu0 %v860_v1  ;;  %847 = vmatpush3.bf16.msra.mxu1 %v860_v1  ;;  %v874_v15 = vld [vmem:[#allocation2 + $0x58] sm:$0xff]   ;;  %v876_v17 = vld [vmem:[#allocation2 + $0x60] sm:$0xff]   ;;  %v878_v19 = vld [vmem:[#allocation2 + $0x68] sm:$0xff]  }
  0x23   :  { %794 = vmatprep.subr.bf16.mxu0 %v861_v2  ;;  %840 = vmatprep.subr.bf16.mxu1 %v861_v2  ;;  %v879_v20 = vld [vmem:[#allocation2 + $0x30] sm:$0xff]   ;;  %v881_v22 = vld [vmem:[#allocation2 + $0x38] sm:$0xff]   ;;  %v989_v26 = vld [vmem:[%s1031_s2] ss:$0 sm:$0xff]  ;;  %s953_s2 = smov [#allocation7]  }
  0x24   :  { %v880_v21 = vld [vmem:[#allocation2 + $0x70] sm:$0xff]   ;;  %v882_v23 = vld [vmem:[#allocation2 + $0x78] sm:$0xff]   ;;  %s569_s24 = sshll.u32 %s953_s2, 4  ;;  %s570_s24 = int_to_ptr.vmem [resolvable:$true] %s569_s24 }
  0x25   :  { %s923_s25 = scalar_lea.vmem %s570_s24, 2048  ;;  %p928_p11 = scmp.lt.s32.totalorder %s570_s24, %s570_s24 }
  0x26   :  { %795 = vmatpush3.bf16.msra.mxu0 %v861_v2  ;;  %848 = vmatpush3.bf16.msra.mxu1 %v861_v2  ;;  %p924_p10 = scmp.ne.s32.totalorder %s570_s24, %s923_s25  ;;  %p929_p12 = scmp.lt.s32.totalorder %s923_s25, %s923_s25 }
  0x27   :  { %796 = vmatprep.subr.bf16.mxu0 %v862_v3  ;;  %841 = vmatprep.subr.bf16.mxu1 %v862_v3 }
  0x28   :  { %p930_p13 = por %p929_p12, %p928_p11 }
  0x2a   :  { %797 = vmatpush3.bf16.msra.mxu0 %v862_v3  ;;  %849 = vmatpush3.bf16.msra.mxu1 %v862_v3  ;;  %p931_p0 = pnand %p930_p13, %p924_p10 }
  0x2b   :  { %798 = vmatprep.subr.bf16.mxu0 %v863_v6  ;;  %842 = vmatprep.subr.bf16.mxu1 %v863_v6 }
  0x2e   :  { %799 = vmatpush3.bf16.msra.mxu0 %v863_v6  ;;  %850 = vmatpush3.bf16.msra.mxu1 %v863_v6 }
  0x2f   :  { %800 = vmatprep.subr.bf16.mxu0 %v864_v7  ;;  %843 = vmatprep.subr.bf16.mxu1 %v864_v7 }
  0x32   :  { %801 = vmatpush3.bf16.msra.mxu0 %v864_v7  ;;  %851 = vmatpush3.bf16.msra.mxu1 %v864_v7 }
  0x33   :  { %802 = vmatprep.subr.bf16.mxu0 %v865_v8  ;;  %844 = vmatprep.subr.bf16.mxu1 %v865_v8 }
  0x36   :  { %803 = vmatpush3.bf16.msra.mxu0 %v865_v8  ;;  %852 = vmatpush3.bf16.msra.mxu1 %v865_v8 }
  0x37   :  { %804 = vmatprep.subr.bf16.mxu0 %v866_v9  ;;  %845 = vmatprep.subr.bf16.mxu1 %v866_v9 }
  0x3a   :  { %805 = vmatpush3.bf16.msra.mxu0 %v866_v9  ;;  %853 = vmatpush3.bf16.msra.mxu1 %v866_v9 }
  0x3d   :  { %807 = vmatmul.mubr.bf16.vlgmr.msra.gmra.mxu0 %v869_v10  ;;  %823 = vmatmul.mubr.bf16.vlgmr.msra.gmra.mxu1 %v870_v11 }
  0x3e   :  { %810 = vmatprep.mubr.bf16.mxu0 %v871_v12  ;;  %826 = vmatprep.mubr.bf16.mxu1 %v872_v13 }
  0x45   :  { %811 = vmatmul.mubr.bf16.gmra.mxu0 %v873_v14  ;;  %827 = vmatmul.mubr.bf16.gmra.mxu1 %v874_v15 }
  0x46   :  { %814 = vmatprep.mubr.bf16.mxu0 %v875_v16  ;;  %830 = vmatprep.mubr.bf16.mxu1 %v876_v17 }
  0x4d   :  { %815 = vmatmul.mubr.bf16.gmra.mxu0 %v877_v18  ;;  %831 = vmatmul.mubr.bf16.gmra.mxu1 %v878_v19 }
  0x4e   :  { %818 = vmatprep.mubr.bf16.mxu0 %v879_v20  ;;  %834 = vmatprep.mubr.bf16.mxu1 %v880_v21 }
  0x55   :  { %819 = vmatmul.mubr.bf16.gmra.mxu0 %v881_v22  ;;  %835 = vmatmul.mubr.bf16.gmra.mxu1 %v882_v23 }
  0xfd   :  { %v808_v24 = vpop.f32.mrf.mxu0  ;;  %v824_v25 = vpop.f32.mrf.mxu1 }
  0xfe   :  { %v286_v31 = vadd.f32 %v808_v24, %v989_v26  ;;  %v350_v32 = vadd.f32 %v824_v25, %v989_v26 }
  0xff   :  { %v277_v27 = vpop.f32.mrf.mxu0  ;;  %v341_v28 = vpop.f32.mrf.mxu1 }
 0x100   :  { %v278_v35 = vadd.f32 %v989_v26, %v277_v27  ;;  %v342_v36 = vadd.f32 %v989_v26, %v341_v28 }
 0x101   :  { %v809_v29 = vpop.f32.mrf.mxu0  ;;  %v825_v30 = vpop.f32.mrf.mxu1 }
 0x102   :  { %v289_v33 = vadd.f32 %v809_v29, %v989_v26  ;;  %v353_v34 = vadd.f32 %v825_v30, %v989_v26 }
 0x103   :  { %v280_v37 = vpop.f32.mrf.mxu0  ;;  %v344_v38 = vpop.f32.mrf.mxu1 }
 0x104   :  { %v679_v39 = vpack.c.bf16 %v289_v33, %v286_v31  ;;  %v719_v40 = vpack.c.bf16 %v353_v34, %v350_v32  ;;  %v281_v41 = vadd.f32 %v989_v26, %v280_v37  ;;  %v345_v42 = vadd.f32 %v989_v26, %v344_v38 }
 0x105   :  { %v812_v43 = vpop.f32.mrf.mxu0  ;;  %v828_v44 = vpop.f32.mrf.mxu1 }
 0x106   :  { %751 = vst [vmem:[#allocation7 + $0x8] sm:$0xff] %v679_v39   ;;  %759 = vst [vmem:[#allocation7 + $0x48] sm:$0xff] %v719_v40   ;;  %v674_v45 = vpack.c.bf16 %v281_v41, %v278_v35  ;;  %v714_v46 = vpack.c.bf16 %v345_v42, %v342_v36  ;;  %v302_v51 = vadd.f32 %v812_v43, %v989_v26 }
 0x107   :  { %v293_v47 = vpop.f32.mrf.mxu0  ;;  %v357_v48 = vpop.f32.mrf.mxu1  ;;  %v366_v52 = vadd.f32 %v828_v44, %v989_v26 }
 0x108   :  { %675 = vst [vmem:[#allocation7] sm:$0xff] %v674_v45   ;;  %758 = vst [vmem:[#allocation7 + $0x40] sm:$0xff] %v714_v46   ;;  %v294_v55 = vadd.f32 %v989_v26, %v293_v47  ;;  %v358_v56 = vadd.f32 %v989_v26, %v357_v48 }
 0x109   :  { %v813_v49 = vpop.f32.mrf.mxu0  ;;  %v829_v50 = vpop.f32.mrf.mxu1 }
 0x10a   :  { %v305_v53 = vadd.f32 %v813_v49, %v989_v26  ;;  %v369_v54 = vadd.f32 %v829_v50, %v989_v26 }
 0x10b   :  { %v296_v57 = vpop.f32.mrf.mxu0  ;;  %v360_v58 = vpop.f32.mrf.mxu1 }
 0x10c   :  { %v689_v59 = vpack.c.bf16 %v305_v53, %v302_v51  ;;  %v729_v60 = vpack.c.bf16 %v369_v54, %v366_v52  ;;  %v297_v61 = vadd.f32 %v989_v26, %v296_v57  ;;  %v361_v62 = vadd.f32 %v989_v26, %v360_v58 }
 0x10d   :  { %v816_v63 = vpop.f32.mrf.mxu0  ;;  %v832_v0 = vpop.f32.mrf.mxu1 }
 0x10e   :  { %753 = vst [vmem:[#allocation7 + $0x18] sm:$0xff] %v689_v59   ;;  %761 = vst [vmem:[#allocation7 + $0x58] sm:$0xff] %v729_v60   ;;  %v684_v1 = vpack.c.bf16 %v297_v61, %v294_v55  ;;  %v724_v2 = vpack.c.bf16 %v361_v62, %v358_v56  ;;  %v318_v7 = vadd.f32 %v816_v63, %v989_v26 }
 0x10f   :  { %v309_v3 = vpop.f32.mrf.mxu0  ;;  %v373_v4 = vpop.f32.mrf.mxu1  ;;  %v382_v8 = vadd.f32 %v832_v0, %v989_v26 }
 0x110   :  { %752 = vst [vmem:[#allocation7 + $0x10] sm:$0xff] %v684_v1   ;;  %760 = vst [vmem:[#allocation7 + $0x50] sm:$0xff] %v724_v2   ;;  %v310_v11 = vadd.f32 %v989_v26, %v309_v3  ;;  %v374_v12 = vadd.f32 %v989_v26, %v373_v4 }
 0x111   :  { %v817_v5 = vpop.f32.mrf.mxu0  ;;  %v833_v6 = vpop.f32.mrf.mxu1 }
 0x112   :  { %v321_v9 = vadd.f32 %v817_v5, %v989_v26  ;;  %v385_v10 = vadd.f32 %v833_v6, %v989_v26 }
 0x113   :  { %v312_v13 = vpop.f32.mrf.mxu0  ;;  %v376_v14 = vpop.f32.mrf.mxu1 }
 0x114   :  { %v699_v15 = vpack.c.bf16 %v321_v9, %v318_v7  ;;  %v739_v16 = vpack.c.bf16 %v385_v10, %v382_v8  ;;  %v313_v17 = vadd.f32 %v989_v26, %v312_v13  ;;  %v377_v18 = vadd.f32 %v989_v26, %v376_v14 }
 0x115   :  { %v820_v19 = vpop.f32.mrf.mxu0  ;;  %v836_v20 = vpop.f32.mrf.mxu1 }
 0x116   :  { %755 = vst [vmem:[#allocation7 + $0x28] sm:$0xff] %v699_v15   ;;  %763 = vst [vmem:[#allocation7 + $0x68] sm:$0xff] %v739_v16   ;;  %v694_v21 = vpack.c.bf16 %v313_v17, %v310_v11  ;;  %v734_v22 = vpack.c.bf16 %v377_v18, %v374_v12  ;;  %v334_v28 = vadd.f32 %v820_v19, %v989_v26 }
 0x117   :  { %v325_v23 = vpop.f32.mrf.mxu0  ;;  %v389_v24 = vpop.f32.mrf.mxu1  ;;  %v398_v29 = vadd.f32 %v836_v20, %v989_v26 }
 0x118   :  { %754 = vst [vmem:[#allocation7 + $0x20] sm:$0xff] %v694_v21   ;;  %762 = vst [vmem:[#allocation7 + $0x60] sm:$0xff] %v734_v22   ;;  %v326_v32 = vadd.f32 %v989_v26, %v325_v23  ;;  %v390_v33 = vadd.f32 %v989_v26, %v389_v24 }
 0x119   :  { %v821_v25 = vpop.f32.mrf.mxu0  ;;  %v837_v27 = vpop.f32.mrf.mxu1 }
 0x11a   :  { %v337_v30 = vadd.f32 %v821_v25, %v989_v26  ;;  %v401_v31 = vadd.f32 %v837_v27, %v989_v26 }
 0x11b   :  { %v328_v34 = vpop.f32.mrf.mxu0  ;;  %v392_v35 = vpop.f32.mrf.mxu1 }
 0x11c   :  { %v709_v36 = vpack.c.bf16 %v337_v30, %v334_v28  ;;  %v749_v37 = vpack.c.bf16 %v401_v31, %v398_v29  ;;  %v329_v38 = vadd.f32 %v989_v26, %v328_v34  ;;  %v393_v39 = vadd.f32 %v989_v26, %v392_v35 }
 0x11e   :  { %757 = vst [vmem:[#allocation7 + $0x38] sm:$0xff] %v709_v36   ;;  %765 = vst [vmem:[#allocation7 + $0x78] sm:$0xff] %v749_v37   ;;  %v704_v40 = vpack.c.bf16 %v329_v38, %v326_v32  ;;  %v744_v41 = vpack.c.bf16 %v393_v39, %v390_v33 }
 0x120   :  { %756 = vst [vmem:[#allocation7 + $0x30] sm:$0xff] %v704_v40   ;;  %764 = vst [vmem:[#allocation7 + $0x70] sm:$0xff] %v744_v41  }
 0x121   :  { %934 = shalt.err (!%p931_p0)
}
 0x122   :  { %575 = dma.vmem_to_hbm [thread:$0]  %s570_s24, 2048, %s1032_s3, [#allocation4], %s950_s15, %s950_s15, %s951_s16  }
 0x123   :  { %947 = dma.done.wait [#allocation4], 2048  }
 0x124   :  { %948 = vsyncadd [#allocation4], 4294965248 }
 0x125   :  { %579 = vsyncpa [#allocation3], 1 }
 0x126   :  { %580 = vsyncpa [#allocation6], 1 }
 0x127   :  { %581 = vsyncpa [#allocation4], 1 }

</bundles_post_ra>
